<compile_context>
chip_gen: v6e
topology: v6e:2x2x1
jax: 0.10.0
libtpu: 0.0.40
codegen_flags: <defaults>
</compile_context>

<pallas_src>
import jax
import jax.numpy as jnp
from jax.experimental import pallas as pl
from jax.experimental.pallas import tpu as pltpu

LANES = 128        # vreg lane width: last dim of every block
BLOCK_ROWS = 1024  # sublane rows per grid step -> 1024*128*4 B = 512 KiB / coord / block


def _drift_kernel(length_ref, x_ref, px_ref, y_ref, py_ref, xo_ref, yo_ref):
    """Pure-VPU drift update on one (block_rows, 128) tile per coordinate.

    x -> x + L*px ; y -> y + L*py.  Unchanged coordinates are never touched
    by the kernel (they pass through in the wrapper).
    """
    length = length_ref[0]
    xo_ref[...] = x_ref[...] + length * px_ref[...]
    yo_ref[...] = y_ref[...] + length * py_ref[...]


def drift_forward(bunch, length):
    """bunch: tuple (x, px, y, py, tau, delta) of shape-(N,) arrays."""
    x, px, y, py, tau, delta = bunch
    n = x.shape[0]

    # Pad only the 4 coordinates the kernel reads up to a lane multiple and
    # view them as (rows, 128) slabs.  For N % 128 == 0 the pad is a no-op.
    pad = (-n) % LANES

    def prep(a):
        a = a.astype(jnp.float32)
        if pad:
            a = jnp.pad(a, (0, pad))
        return a.reshape(-1, LANES)

    xr, pxr, yr, pyr = prep(x), prep(px), prep(y), prep(py)
    rows = xr.shape[0]

    # Block: multiple of 8 sublanes, or the full (possibly small) extent.
    block_rows = rows if rows <= BLOCK_ROWS else BLOCK_ROWS
    grid = (pl.cdiv(rows, block_rows),)

    tile_spec = pl.BlockSpec((block_rows, LANES), lambda i: (i, 0))
    length_arr = jnp.asarray(length, dtype=jnp.float32).reshape((1,))

    new_x2d, new_y2d = pl.pallas_call(
        _drift_kernel,
        out_shape=(
            jax.ShapeDtypeStruct((rows, LANES), jnp.float32),
            jax.ShapeDtypeStruct((rows, LANES), jnp.float32),
        ),
        grid_spec=pltpu.PrefetchScalarGridSpec(
            num_scalar_prefetch=0,
            grid=grid,
            in_specs=[
                pl.BlockSpec(memory_space=pltpu.MemorySpace.SMEM),  # length (1,)
                tile_spec,  # x
                tile_spec,  # px
                tile_spec,  # y
                tile_spec,  # py
            ],
            out_specs=(tile_spec, tile_spec),
        ),
        compiler_params=pltpu.CompilerParams(
            dimension_semantics=("parallel",),
        ),
    )(length_arr, xr, pxr, yr, pyr)

    new_x = new_x2d.reshape(-1)[:n]
    new_y = new_y2d.reshape(-1)[:n]
    # px, py, tau, delta are returned untouched: zero kernel / HBM traffic.
    return (new_x, px, new_y, py, tau, delta)


class Drift:
    """JAX/Pallas port of the PyTorch Drift element (single DriftMap)."""

    def __init__(self, length: float, slices: int = 1, order: int = 2):
        self.length = length
        self.slices = slices
        self.order = order
        # DriftMap "weight" parameter (deterministic init = drift length).
        self.weight = jnp.asarray([length], dtype=jnp.float32)

    def forward(self, bunch: tuple):
        return drift_forward(bunch, self.weight)

    def __call__(self, bunch: tuple):
        return self.forward(bunch)

    def rMatrix(self):
        r = jnp.eye(6, dtype=jnp.float32)
        r = r.at[0, 1].set(self.length)
        r = r.at[2, 3].set(self.length)
        return r

    def getWeights(self):
        return [self.weight.tolist()]

    def setWeights(self, weights):
        w = iter(weights)
        self.weight = jnp.asarray(next(w), dtype=jnp.float32).reshape((1,))


if __name__ == "__main__":
    key = jax.random.PRNGKey(0)
    n_particles = 1024  # small synthetic bunch (8 sublane-rows x 128 lanes)

    keys = jax.random.split(key, 6)
    # bunch = (x, px, y, py, tau, delta), each shape (N,)
    bunch = tuple(
        jax.random.normal(k, (n_particles,), dtype=jnp.float32) * 1e-3
        for k in keys
    )

    drift = Drift(length=1.5, slices=1, order=2)
    out = drift(bunch)
    out = jax.tree_util.tree_map(jax.block_until_ready, out)

    # Reference (plain JAX) check of the drift map semantics.
    x, px, y, py, tau, delta = bunch
    ref = (x + drift.length * px, px, y + drift.length * py, py, tau, delta)
    for o, r in zip(out, ref):
        assert o.shape == r.shape and o.dtype == jnp.float32
        assert jnp.max(jnp.abs(o - r)) < 1e-6

    print("KERNEL_OK")
</pallas_src>

<mosaic_0001>
module attributes {stable_mosaic.version = 11 : i64} {
  func.func @_drift_kernel(%arg0: i32, %arg1: memref<1xf32, #tpu.memory_space<smem>>, %arg2: memref<8x128xf32, #tpu.memory_space<vmem>>, %arg3: memref<8x128xf32, #tpu.memory_space<vmem>>, %arg4: memref<8x128xf32, #tpu.memory_space<vmem>>, %arg5: memref<8x128xf32, #tpu.memory_space<vmem>>, %arg6: memref<8x128xf32, #tpu.memory_space<vmem>>, %arg7: memref<8x128xf32, #tpu.memory_space<vmem>>) attributes {dimension_semantics = [#tpu.dimension_semantics<parallel>], iteration_bounds = array<i64: 1>, scalar_prefetch = 0 : i64, scratch_operands = 0 : i64, tpu.core_type = #tpu.core_type<tc>, window_params = [{transform_indices = @transform_0, window_bounds = array<i64: 1>}, {transform_indices = @transform_1, window_bounds = array<i64: 8, 128>}, {transform_indices = @transform_2, window_bounds = array<i64: 8, 128>}, {transform_indices = @transform_3, window_bounds = array<i64: 8, 128>}, {transform_indices = @transform_4, window_bounds = array<i64: 8, 128>}, {transform_indices = @transform_5, window_bounds = array<i64: 8, 128>}, {transform_indices = @transform_6, window_bounds = array<i64: 8, 128>}]} {
    %c0 = arith.constant 0 : index
    %0 = memref.load %arg1[%c0] : memref<1xf32, #tpu.memory_space<smem>>
    %c0_0 = arith.constant 0 : index
    %c0_1 = arith.constant 0 : index
    %1 = vector.load %arg2[%c0_0, %c0_1] : memref<8x128xf32, #tpu.memory_space<vmem>>, vector<8x128xf32>
    %c0_2 = arith.constant 0 : index
    %c0_3 = arith.constant 0 : index
    %2 = vector.load %arg3[%c0_2, %c0_3] : memref<8x128xf32, #tpu.memory_space<vmem>>, vector<8x128xf32>
    %3 = vector.broadcast %0 : f32 to vector<8x128xf32>
    %4 = arith.mulf %3, %2 : vector<8x128xf32>
    %5 = arith.addf %1, %4 : vector<8x128xf32>
    %c0_4 = arith.constant 0 : index
    %c0_5 = arith.constant 0 : index
    %6 = vector.load %arg6[%c0_4, %c0_5] : memref<8x128xf32, #tpu.memory_space<vmem>>, vector<8x128xf32>
    tpu.vector_store %arg6[%c0_4, %c0_5], %5 {strides = array<i32>} : memref<8x128xf32, #tpu.memory_space<vmem>>, vector<8x128xf32>,
    %c0_6 = arith.constant 0 : index
    %c0_7 = arith.constant 0 : index
    %7 = vector.load %arg4[%c0_6, %c0_7] : memref<8x128xf32, #tpu.memory_space<vmem>>, vector<8x128xf32>
    %c0_8 = arith.constant 0 : index
    %c0_9 = arith.constant 0 : index
    %8 = vector.load %arg5[%c0_8, %c0_9] : memref<8x128xf32, #tpu.memory_space<vmem>>, vector<8x128xf32>
    %9 = vector.broadcast %0 : f32 to vector<8x128xf32>
    %10 = arith.mulf %9, %8 : vector<8x128xf32>
    %11 = arith.addf %7, %10 : vector<8x128xf32>
    %c0_10 = arith.constant 0 : index
    %c0_11 = arith.constant 0 : index
    %12 = vector.load %arg7[%c0_10, %c0_11] : memref<8x128xf32, #tpu.memory_space<vmem>>, vector<8x128xf32>
    tpu.vector_store %arg7[%c0_10, %c0_11], %11 {strides = array<i32>} : memref<8x128xf32, #tpu.memory_space<vmem>>, vector<8x128xf32>,
    return
  }
  func.func @transform_0(%arg0: i32) -> i32 {
    %c0_i32 = arith.constant 0 : i32
    %c0_i32_0 = arith.constant 0 : i32
    return %c0_i32 : i32
  }
  func.func @transform_1(%arg0: i32) -> (i32, i32) {
    %c0_i32 = arith.constant 0 : i32
    %c0_i32_0 = arith.constant 0 : i32
    return %arg0, %c0_i32 : i32, i32
  }
  func.func @transform_2(%arg0: i32) -> (i32, i32) {
    %c0_i32 = arith.constant 0 : i32
    %c0_i32_0 = arith.constant 0 : i32
    return %arg0, %c0_i32 : i32, i32
  }
  func.func @transform_3(%arg0: i32) -> (i32, i32) {
    %c0_i32 = arith.constant 0 : i32
    %c0_i32_0 = arith.constant 0 : i32
    return %arg0, %c0_i32 : i32, i32
  }
  func.func @transform_4(%arg0: i32) -> (i32, i32) {
    %c0_i32 = arith.constant 0 : i32
    %c0_i32_0 = arith.constant 0 : i32
    return %arg0, %c0_i32 : i32, i32
  }
  func.func @transform_5(%arg0: i32) -> (i32, i32) {
    %c0_i32 = arith.constant 0 : i32
    %c0_i32_0 = arith.constant 0 : i32
    return %arg0, %c0_i32 : i32, i32
  }
  func.func @transform_6(%arg0: i32) -> (i32, i32) {
    %c0_i32 = arith.constant 0 : i32
    %c0_i32_0 = arith.constant 0 : i32
    return %arg0, %c0_i32 : i32, i32
  }
}

</mosaic_0001>

<bundles_post_ra>
// kernel: tpu_custom_call.1
= control target key start
LH: loop header
LB: loop body
LE: loop exit
PB: predicated region body
PF: predicated region fallthrough
CT: control target
= control target key end

     0   :  { %13 = vsyncpa [#allocation4], 0  ;;  %s313_s0 = inlined_call_operand.<no memory space> [shape: f32[1], index: 0, kind: input, shape index: {}]   ;;  %s314_s1 = inlined_call_operand.hbm [shape: f32[8,128], index: 1, kind: input, shape index: {}]   ;;  %s315_s2 = inlined_call_operand.hbm [shape: f32[8,128], index: 2, kind: input, shape index: {}]   ;;  %s316_s3 = inlined_call_operand.hbm [shape: f32[8,128], index: 3, kind: input, shape index: {}]   ;;  %s317_s4 = inlined_call_operand.hbm [shape: f32[8,128], index: 4, kind: input, shape index: {}]   ;;  %s318_s5 = inlined_call_operand.hbm [shape: f32[8,128], index: 5, kind: output, shape index: {0}]   ;;  %s319_s6 = inlined_call_operand.hbm [shape: f32[8,128], index: 6, kind: output, shape index: {1}]  }
   0x1   :  { %14 = vsyncpa [#allocation7], 0 }
   0x2   :  { %15 = vsyncpa [#allocation10], 0 }
   0x3   :  { %16 = vsyncpa [#allocation5], 0 }
   0x4   :  { %17 = vsyncpa [#allocation13], 0  ;;  %s251_s21 = smov [#allocation6]   ;;  %s252_s23 = smov [#allocation3]  }
   0x5   :  { %s36_s22 = sshll.u32 %s251_s21, 4  ;;  %s26_s24 = sshll.u32 %s252_s23, 4  ;;  %s37_s22 = int_to_ptr.vmem [resolvable:$true] %s36_s22  ;;  %s27_s24 = int_to_ptr.vmem [resolvable:$true] %s26_s24 }
   0x6   :  { %s129_s25 = scalar_lea.vmem %s37_s22, 128  ;;  %p134_p1 = scmp.lt.s32.totalorder %s37_s22, %s37_s22 }
   0x7   :  { %p130_p0 = scmp.ne.s32.totalorder %s37_s22, %s129_s25  ;;  %p135_p2 = scmp.lt.s32.totalorder %s129_s25, %s129_s25 }
   0x9   :  { %p136_p3 = por %p135_p2, %p134_p1 }
   0xb   :  { %p137_p4 = pnand %p136_p3, %p130_p0 }
   0xd   :  { %140 = shalt.err (!%p137_p4)
}
   0xe   :  { %39 = dma.hbm_to_vmem [thread:$0]  %s315_s2, 128, %s37_s22, [#allocation7]  }
   0xf   :  { %s149_s28 = scalar_lea.vmem %s27_s24, 128  ;;  %p154_p6 = scmp.lt.s32.totalorder %s27_s24, %s27_s24 }
  0x10   :  { %p150_p5 = scmp.ne.s32.totalorder %s27_s24, %s149_s28  ;;  %p155_p7 = scmp.lt.s32.totalorder %s149_s28, %s149_s28 }
  0x12   :  { %p156_p8 = por %p155_p7, %p154_p6 }
  0x14   :  { %p157_p9 = pnand %p156_p8, %p150_p5 }
  0x16   :  { %160 = shalt.err (!%p157_p9)
}
  0x17   :  { %29 = dma.hbm_to_vmem [thread:$0]  %s314_s1, 128, %s27_s24, [#allocation4]  }
  0x18   :  { %s253_s7 = smov [#allocation8]   ;;  %s254_s9 = smov [#allocation9]  }
  0x19   :  { %s46_s8 = sshll.u32 %s253_s7, 4  ;;  %s56_s10 = sshll.u32 %s254_s9, 4  ;;  %s47_s8 = int_to_ptr.vmem [resolvable:$true] %s46_s8  ;;  %s57_s10 = int_to_ptr.vmem [resolvable:$true] %s56_s10 }
  0x1a   :  { %s169_s11 = scalar_lea.vmem %s47_s8, 128  ;;  %p174_p11 = scmp.lt.s32.totalorder %s47_s8, %s47_s8 }
  0x1b   :  { %p170_p10 = scmp.ne.s32.totalorder %s47_s8, %s169_s11  ;;  %p175_p12 = scmp.lt.s32.totalorder %s169_s11, %s169_s11 }
  0x1d   :  { %p176_p13 = por %p175_p12, %p174_p11 }
  0x1f   :  { %p177_p0 = pnand %p176_p13, %p170_p10 }
  0x21   :  { %180 = shalt.err (!%p177_p0)
}
  0x22   :  { %49 = dma.hbm_to_vmem [thread:$0]  %s316_s3, 128, %s47_s8, [#allocation7]  }
  0x23   :  { %s189_s13 = scalar_lea.vmem %s57_s10, 128  ;;  %p194_p2 = scmp.lt.s32.totalorder %s57_s10, %s57_s10 }
  0x24   :  { %p190_p1 = scmp.ne.s32.totalorder %s57_s10, %s189_s13  ;;  %p195_p3 = scmp.lt.s32.totalorder %s189_s13, %s189_s13 }
  0x26   :  { %p196_p4 = por %p195_p3, %p194_p2 }
  0x28   :  { %p197_p5 = pnand %p196_p4, %p190_p1 }
  0x2a   :  { %200 = shalt.err (!%p197_p5)
}
  0x2b   :  { %59 = dma.hbm_to_vmem [thread:$0]  %s317_s4, 128, %s57_s10, [#allocation10]  }
  0x2c   :  { %241 = dma.done.wait [#allocation4], 128  }
  0x2d   :  { %242 = vsyncadd [#allocation4], 4294967168 }
  0x2e   :  { %243 = dma.done.wait [#allocation7], 256  }
  0x2f   :  { %244 = vsyncadd [#allocation7], 4294967040 }
  0x30   :  { %245 = dma.done.wait [#allocation10], 128  }
  0x31   :  { %246 = vsyncadd [#allocation10], 4294967168  ;;  %v75_v0 = vstv %s313_s0  ;;  %v73_v1 = vld [vmem:[#allocation3] sm:$0xff]  ;;  %v74_v2 = vld [vmem:[#allocation6] sm:$0xff]  ;;  %s255_s3 = smov [#allocation11]   ;;  %s256_s18 = smov [#allocation12]  }
  0x32   :  { %s90_s17 = sshll.u32 %s255_s3, 4  ;;  %v76_v3 = vmul.f32 %v75_v0, %v74_v2  ;;  %v79_v4 = vld [vmem:[#allocation8] sm:$0xff]  ;;  %v80_v5 = vld [vmem:[#allocation9] sm:$0xff]  ;;  %s100_s19 = sshll.u32 %s256_s18, 4  ;;  %s91_s17 = int_to_ptr.vmem [resolvable:$true] %s90_s17  ;;  %s101_s19 = int_to_ptr.vmem [resolvable:$true] %s100_s19 }
  0x33   :  { %v81_v6 = vmul.f32 %v80_v5, %v75_v0  ;;  %s201_s4 = scalar_lea.vmem %s91_s17, 128  ;;  %p206_p7 = scmp.lt.s32.totalorder %s91_s17, %s91_s17 }
  0x34   :  { %v77_v7 = vadd.f32 %v76_v3, %v73_v1  ;;  %p202_p6 = scmp.ne.s32.totalorder %s91_s17, %s201_s4  ;;  %p207_p8 = scmp.lt.s32.totalorder %s201_s4, %s201_s4 }
  0x35   :  { %v82_v8 = vadd.f32 %v81_v6, %v79_v4 }
  0x36   :  { %78 = vst [vmem:[#allocation11] sm:$0xff] %v77_v7  ;;  %p208_p9 = por %p207_p8, %p206_p7 }
  0x37   :  { %83 = vst [vmem:[#allocation12] sm:$0xff] %v82_v8 }
  0x38   :  { %p209_p10 = pnand %p208_p9, %p202_p6 }
  0x3a   :  { %212 = shalt.err (!%p209_p10)
}
  0x3b   :  { %93 = dma.vmem_to_hbm [thread:$0]  %s91_s17, 128, %s318_s5, [#allocation5]  }
  0x3c   :  { %s221_s21 = scalar_lea.vmem %s101_s19, 128  ;;  %p226_p12 = scmp.lt.s32.totalorder %s101_s19, %s101_s19 }
  0x3d   :  { %p222_p11 = scmp.ne.s32.totalorder %s101_s19, %s221_s21  ;;  %p227_p13 = scmp.lt.s32.totalorder %s221_s21, %s221_s21 }
  0x3f   :  { %p228_p0 = por %p227_p13, %p226_p12 }
  0x41   :  { %p229_p1 = pnand %p228_p0, %p222_p11 }
  0x43   :  { %232 = shalt.err (!%p229_p1)
}
  0x44   :  { %103 = dma.vmem_to_hbm [thread:$0]  %s101_s19, 128, %s319_s6, [#allocation13]  }
  0x45   :  { %247 = dma.done.wait [#allocation5], 128  }
  0x46   :  { %248 = vsyncadd [#allocation5], 4294967168 }
  0x47   :  { %249 = dma.done.wait [#allocation13], 128  }
  0x48   :  { %250 = vsyncadd [#allocation13], 4294967168 }
  0x49   :  { %110 = vsyncpa [#allocation4], 1 }
  0x4a   :  { %111 = vsyncpa [#allocation7], 1 }
  0x4b   :  { %112 = vsyncpa [#allocation10], 1 }
  0x4c   :  { %113 = vsyncpa [#allocation5], 1 }
  0x4d   :  { %114 = vsyncpa [#allocation13], 1 }

</bundles_post_ra>
